<compile_context>
chip_gen: v7x
topology: tpu7x:2x2x1
jax: 0.10.0
libtpu: 0.0.40
codegen_flags: <defaults>
</compile_context>

<pallas_src>
import jax
import jax.numpy as jnp
from jax.experimental import pallas as pl
from jax.experimental.pallas import tpu as pltpu

Z_DIM = 1024                    # hidden width fixed by the module
DROP_P = 0.5                    # F.dropout default probability
_DROP_SCALE = 1.0 / (1.0 - DROP_P)
_DROP_THRESH_24 = int(round(DROP_P * (1 << 24)))   # keep iff top-24 hash bits >= this


def _dropout_keep_mask(seed_u32, row_base_i32, shape):
    """Deterministic keep-mask; P(keep) = 1 - DROP_P.

    Keyed by (seed, global row, column) so the mask does not depend on the
    batch-tile size. Integer-only: hash -> shift -> integer compare.
    """
    # TODO(synk): bit-exact parity with torch's dropout RNG stream is not
    #             reproducible across frameworks; this is a counter-based hash.
    r = jax.lax.broadcasted_iota(jnp.int32, shape, 0) + row_base_i32
    c = jax.lax.broadcasted_iota(jnp.int32, shape, 1)
    x = ((r << 10) | c).astype(jnp.uint32)            # Z_DIM == 1024 == 2**10
    x = x + (seed_u32 + jnp.uint32(1)) * jnp.uint32(0x9E3779B9)
    # splitmix-style xorshift-multiply finalizer for well-mixed bits.
    x = x ^ (x >> jnp.uint32(16))
    x = x * jnp.uint32(0x7FEB352D)
    x = x ^ (x >> jnp.uint32(15))
    x = x * jnp.uint32(0x846CA68B)
    x = x ^ (x >> jnp.uint32(16))
    u24 = (x >> jnp.uint32(8)).astype(jnp.int32)      # top 24 bits, non-negative
    return u24 >= jnp.int32(_DROP_THRESH_24)


def recon_kernel(seed_ref, x_ref, w1_ref, b1_ref, w2_ref, b2_ref, o_ref, h_acc):
    # Hoist all grid / scalar reads to the top level (never inside pl.when).
    i = pl.program_id(0)
    k = pl.program_id(1)
    nk = pl.num_programs(1)
    seed = seed_ref[0].astype(jnp.uint32)
    tb = h_acc.shape[0]
    row_base = i * tb                                   # global row offset (int32)

    @pl.when(k == 0)
    def _init():
        # Fold the bias into the accumulator init (the zeros-store becomes a
        # bias-store; removes a (tb, Z) f32 add from the epilogue).
        h_acc[...] = jnp.broadcast_to(b1_ref[...], h_acc.shape)

    # fc: partial x @ W1 for this K block; bf16 MXU operands, f32 accumulation.
    h_acc[...] += jnp.dot(x_ref[...].astype(jnp.bfloat16), w1_ref[...],
                          preferred_element_type=jnp.float32)

    @pl.when(k == nk - 1)
    def _epilogue():
        h = jnp.maximum(h_acc[...], 0.0)                               # ReLU (f32)
        keep = _dropout_keep_mask(seed, row_base, h.shape)
        h = jnp.where(keep, h, 0.0)        # dropout; 1/(1-p) scale folded into w2
        # fc1: cast to bf16 only at the MXU boundary; w2 already holds the scale.
        y = jnp.dot(h.astype(jnp.bfloat16), w2_ref[...],
                    preferred_element_type=jnp.float32)
        o_ref[...] = jax.nn.sigmoid(y + b2_ref[...]).astype(o_ref.dtype)


def _round_up(n, m):
    return ((n + m - 1) // m) * m


def _batch_tile(b):
    # Small batches: one full-B tile (block == full dim satisfies the sublane rule).
    # Larger batches: at least two tiles (engages both v7x TensorCores), capped at
    # 512 rows (raises arithmetic intensity on the streamed w1), multiple of 8.
    if b <= 16:
        return b
    tb = min(512, -(-b // 2))
    return min(512, _round_up(tb, 8))


def _k_tile(x_dim):
    # Cap K blocks at 1024 so the (x, w1) streaming buffers + h_acc stay within
    # v5e's default 16 MiB scoped VMEM while keeping double-buffering intact.
    if x_dim <= 1024:
        return x_dim
    for tk in (1024, 512, 256, 128):
        if x_dim % tk == 0:
            return tk
    return x_dim  # fall back to an un-tiled K dimension


def recon_forward(x, w1, b1, w2, b2, seed):
    """x:(B,x_dim); w1:(x_dim,Z); b1:(1,Z); w2:(Z,y_dim); b2:(1,y_dim); seed:(1,) i32."""
    B, x_dim = x.shape
    y_dim = w2.shape[1]
    y_pad = _round_up(max(y_dim, 128), 128)

    # Weights bf16 for the MXU / halved DMA bytes; biases f32.
    w1 = w1.astype(jnp.bfloat16)
    b1 = b1.astype(jnp.float32)
    # Fold the dropout scale into w2 and pad y_dim up to a lane-dense multiple of
    # 128 (full-width MXU N dim, unmasked output stores). Padding is zeros; the
    # padded output columns are sliced off below.
    w2p = jnp.zeros((Z_DIM, y_pad), jnp.bfloat16).at[:, :y_dim].set(
        (w2.astype(jnp.float32) * jnp.float32(_DROP_SCALE)).astype(jnp.bfloat16))
    b2p = jnp.zeros((1, y_pad), jnp.float32).at[:, :y_dim].set(b2.astype(jnp.float32))

    tb = _batch_tile(B)
    tk = _k_tile(x_dim)
    grid = (pl.cdiv(B, tb), pl.cdiv(x_dim, tk))

    grid_spec = pltpu.PrefetchScalarGridSpec(
        num_scalar_prefetch=1,          # seed lands in SMEM
        grid=grid,
        in_specs=[
            pl.BlockSpec((tb, tk), lambda i, k, seed: (i, k)),        # x (streamed)
            pl.BlockSpec((tk, Z_DIM), lambda i, k, seed: (k, 0)),     # w1 (streamed over K)
            pl.BlockSpec((1, Z_DIM), lambda i, k, seed: (0, 0)),      # b1 (resident)
            pl.BlockSpec((Z_DIM, y_pad), lambda i, k, seed: (0, 0)),  # w2 (resident)
            pl.BlockSpec((1, y_pad), lambda i, k, seed: (0, 0)),      # b2 (resident)
        ],
        out_specs=pl.BlockSpec((tb, y_pad), lambda i, k, seed: (i, 0)),
        scratch_shapes=[pltpu.VMEM((tb, Z_DIM), jnp.float32)],        # h accumulator
    )

    out = pl.pallas_call(
        recon_kernel,
        out_shape=jax.ShapeDtypeStruct((B, y_pad), jnp.float32),
        grid_spec=grid_spec,
        compiler_params=pltpu.CompilerParams(
            dimension_semantics=("parallel", "arbitrary"),
            vmem_limit_bytes=48 * 1024 * 1024),
    )(seed, x, w1, b1, w2p, b2p)

    return out[:, :y_dim]


def init_params(key, x_dim, y_dim):
    """PyTorch-Linear-style init; weights stored bf16 in HBM, biases f32."""
    k1, k2, k3, k4 = jax.random.split(key, 4)
    bound1 = 1.0 / jnp.sqrt(x_dim)
    bound2 = 1.0 / jnp.sqrt(Z_DIM)
    w1 = jax.random.uniform(k1, (x_dim, Z_DIM), jnp.float32, -bound1, bound1)
    b1 = jax.random.uniform(k2, (1, Z_DIM), jnp.float32, -bound1, bound1)
    w2 = jax.random.uniform(k3, (Z_DIM, y_dim), jnp.float32, -bound2, bound2)
    b2 = jax.random.uniform(k4, (1, y_dim), jnp.float32, -bound2, bound2)
    return w1.astype(jnp.bfloat16), b1, w2.astype(jnp.bfloat16), b2


def recon_reference(x, w1, b1, w2, b2, seed):
    """Pure-JAX reference reproducing the kernel math (incl. the dropout mask)."""
    h = jnp.dot(x.astype(jnp.bfloat16), w1.astype(jnp.bfloat16),
                preferred_element_type=jnp.float32) + b1.astype(jnp.float32)
    h = jnp.maximum(h, 0.0)
    keep = _dropout_keep_mask(jnp.uint32(seed), jnp.int32(0), h.shape)
    h = jnp.where(keep, h * jnp.float32(_DROP_SCALE), 0.0)
    y = jnp.dot(h.astype(jnp.bfloat16), w2.astype(jnp.bfloat16),
                preferred_element_type=jnp.float32) + b2.astype(jnp.float32)
    return jax.nn.sigmoid(y)


def _check(B, x_dim, y_dim, key):
    k_x, k_p, _ = jax.random.split(key, 3)
    x = jax.random.normal(k_x, (B, x_dim), dtype=jnp.float32)
    w1, b1, w2, b2 = init_params(k_p, x_dim, y_dim)
    seed = jnp.array([0], dtype=jnp.int32)

    out = recon_forward(x, w1, b1, w2, b2, seed)
    jax.block_until_ready(out)

    assert out.shape == (B, y_dim)
    assert bool(jnp.all(jnp.isfinite(out)))
    assert bool(jnp.all((out >= 0.0) & (out <= 1.0)))   # sigmoid output range

    ref = recon_reference(x, w1, b1, w2, b2, seed[0])
    assert bool(jnp.allclose(out, ref, atol=3e-2, rtol=3e-2))


if __name__ == "__main__":
    key = jax.random.PRNGKey(0)
    k1, k2 = jax.random.split(key)

    # Small default shapes consistent with the module.
    _check(B=8, x_dim=64, y_dim=32, key=k1)
    # Exercise the K-accumulation and multi-batch-tile paths (grid = (2, 2)).
    _check(B=32, x_dim=2048, y_dim=32, key=k2)

    print("KERNEL_OK")
</pallas_src>

<mosaic_0001>
module attributes {stable_mosaic.version = 11 : i64} {
  func.func @recon_kernel(%arg0: i32, %arg1: i32, %arg2: memref<1xi32, #tpu.memory_space<smem>>, %arg3: memref<8x64xf32, #tpu.memory_space<vmem>>, %arg4: memref<64x1024xbf16, #tpu.memory_space<vmem>>, %arg5: memref<1x1024xf32, #tpu.memory_space<vmem>>, %arg6: memref<1024x128xbf16, #tpu.memory_space<vmem>>, %arg7: memref<1x128xf32, #tpu.memory_space<vmem>>, %arg8: memref<8x128xf32, #tpu.memory_space<vmem>>, %arg9: memref<8x1024xf32, #tpu.memory_space<vmem>>) attributes {dimension_semantics = [#tpu.dimension_semantics<parallel>, #tpu.dimension_semantics<arbitrary>], iteration_bounds = array<i64: 1, 1>, scalar_prefetch = 1 : i64, scratch_operands = 1 : i64, tpu.core_type = #tpu.core_type<tc>, window_params = [{transform_indices = @transform_0, window_bounds = array<i64: 8, 64>}, {transform_indices = @transform_1, window_bounds = array<i64: 64, 1024>}, {pipeline_mode = #tpu.pipeline_mode<synchronous>, transform_indices = @transform_2, window_bounds = array<i64: 1, 1024>}, {pipeline_mode = #tpu.pipeline_mode<synchronous>, transform_indices = @transform_3, window_bounds = array<i64: 1024, 128>}, {pipeline_mode = #tpu.pipeline_mode<synchronous>, transform_indices = @transform_4, window_bounds = array<i64: 1, 128>}, {transform_indices = @transform_5, window_bounds = array<i64: 8, 128>}]} {
    %c0 = arith.constant 0 : index
    %0 = memref.load %arg2[%c0] : memref<1xi32, #tpu.memory_space<smem>>
    %c8_i32 = arith.constant 8 : i32
    %1 = arith.muli %arg0, %c8_i32 : i32
    %c0_i32 = arith.constant 0 : i32
    %2 = arith.cmpi eq, %arg1, %c0_i32 : i32
    %3 = arith.extui %2 : i1 to i32
    %c0_i32_0 = arith.constant 0 : i32
    %4 = arith.cmpi ne, %3, %c0_i32_0 : i32
    scf.if %4 {
      %c0_11 = arith.constant 0 : index
      %c0_12 = arith.constant 0 : index
      %15 = vector.load %arg5[%c0_11, %c0_12] : memref<1x1024xf32, #tpu.memory_space<vmem>>, vector<1x1024xf32>
      %16 = vector.shape_cast %15 : vector<1x1024xf32> to vector<1x1024xf32>
      %17 = vector.broadcast %16 : vector<1x1024xf32> to vector<8x1024xf32>
      %c0_13 = arith.constant 0 : index
      %c0_14 = arith.constant 0 : index
      %18 = vector.load %arg9[%c0_13, %c0_14] : memref<8x1024xf32, #tpu.memory_space<vmem>>, vector<8x1024xf32>
      tpu.vector_store %arg9[%c0_13, %c0_14], %17 {strides = array<i32>} : memref<8x1024xf32, #tpu.memory_space<vmem>>, vector<8x1024xf32>,
    } else {
    }
    %c0_1 = arith.constant 0 : index
    %c0_2 = arith.constant 0 : index
    %5 = vector.load %arg9[%c0_1, %c0_2] : memref<8x1024xf32, #tpu.memory_space<vmem>>, vector<8x1024xf32>
    %c0_3 = arith.constant 0 : index
    %c0_4 = arith.constant 0 : index
    %6 = vector.load %arg3[%c0_3, %c0_4] : memref<8x64xf32, #tpu.memory_space<vmem>>, vector<8x64xf32>
    %7 = arith.truncf %6 : vector<8x64xf32> to vector<8x64xbf16>
    %c0_5 = arith.constant 0 : index
    %c0_6 = arith.constant 0 : index
    %8 = vector.load %arg4[%c0_5, %c0_6] : memref<64x1024xbf16, #tpu.memory_space<vmem>>, vector<64x1024xbf16>
    %cst = arith.constant dense<0.000000e+00> : vector<8x1024xf32>
    %9 = tpu.matmul %7, %8, %cst {dimension_numbers = #tpu.dot_dimension_numbers<[1], [0], [0], [1], [0, 0, 1, 1], [], []>} : vector<8x64xbf16>, vector<64x1024xbf16>, vector<8x1024xf32> -> vector<8x1024xf32>
    %10 = arith.addf %5, %9 : vector<8x1024xf32>
    %c0_7 = arith.constant 0 : index
    %c0_8 = arith.constant 0 : index
    %11 = vector.load %arg9[%c0_7, %c0_8] : memref<8x1024xf32, #tpu.memory_space<vmem>>, vector<8x1024xf32>
    tpu.vector_store %arg9[%c0_7, %c0_8], %10 {strides = array<i32>} : memref<8x1024xf32, #tpu.memory_space<vmem>>, vector<8x1024xf32>,
    %c0_i32_9 = arith.constant 0 : i32
    %12 = arith.cmpi eq, %arg1, %c0_i32_9 : i32
    %13 = arith.extui %12 : i1 to i32
    %c0_i32_10 = arith.constant 0 : i32
    %14 = arith.cmpi ne, %13, %c0_i32_10 : i32
    scf.if %14 {
      %c0_11 = arith.constant 0 : index
      %c0_12 = arith.constant 0 : index
      %15 = vector.load %arg9[%c0_11, %c0_12] : memref<8x1024xf32, #tpu.memory_space<vmem>>, vector<8x1024xf32>
      %cst_13 = arith.constant 0.000000e+00 : f32
      %16 = vector.broadcast %cst_13 : f32 to vector<8x1024xf32>
      %17 = arith.maximumf %15, %16 : vector<8x1024xf32>
      %18 = tpu.iota {dimensions = array<i32: 0>} : vector<8x1024xi32>
      %19 = vector.broadcast %1 : i32 to vector<8x1024xi32>
      %20 = arith.addi %18, %19 : vector<8x1024xi32>
      %21 = tpu.iota {dimensions = array<i32: 1>} : vector<8x1024xi32>
      %c10_i32 = arith.constant 10 : i32
      %22 = vector.broadcast %c10_i32 : i32 to vector<8x1024xi32>
      %23 = arith.shli %20, %22 : vector<8x1024xi32>
      %24 = arith.ori %23, %21 : vector<8x1024xi32>
      %c1_i32 = arith.constant 1 : i32
      %25 = arith.addi %0, %c1_i32 : i32
      %c-1640531527_i32 = arith.constant -1640531527 : i32
      %26 = arith.muli %25, %c-1640531527_i32 : i32
      %27 = vector.broadcast %26 : i32 to vector<8x1024xi32>
      %28 = arith.addi %24, %27 : vector<8x1024xi32>
      %c16_i32 = arith.constant 16 : i32
      %29 = vector.broadcast %c16_i32 : i32 to vector<8x1024xi32>
      %30 = arith.shrui %28, %29 : vector<8x1024xi32>
      %31 = arith.xori %28, %30 : vector<8x1024xi32>
      %c2146121005_i32 = arith.constant 2146121005 : i32
      %32 = vector.broadcast %c2146121005_i32 : i32 to vector<8x1024xi32>
      %33 = arith.muli %31, %32 : vector<8x1024xi32>
      %c15_i32 = arith.constant 15 : i32
      %34 = vector.broadcast %c15_i32 : i32 to vector<8x1024xi32>
      %35 = arith.shrui %33, %34 : vector<8x1024xi32>
      %36 = arith.xori %33, %35 : vector<8x1024xi32>
      %c-2073254261_i32 = arith.constant -2073254261 : i32
      %37 = vector.broadcast %c-2073254261_i32 : i32 to vector<8x1024xi32>
      %38 = arith.muli %36, %37 : vector<8x1024xi32>
      %c16_i32_14 = arith.constant 16 : i32
      %39 = vector.broadcast %c16_i32_14 : i32 to vector<8x1024xi32>
      %40 = arith.shrui %38, %39 : vector<8x1024xi32>
      %41 = arith.xori %38, %40 : vector<8x1024xi32>
      %c8_i32_15 = arith.constant 8 : i32
      %42 = vector.broadcast %c8_i32_15 : i32 to vector<8x1024xi32>
      %43 = arith.shrui %41, %42 : vector<8x1024xi32>
      %c8388608_i32 = arith.constant 8388608 : i32
      %44 = vector.broadcast %c8388608_i32 : i32 to vector<8x1024xi32>
      %45 = arith.cmpi sge, %43, %44 : vector<8x1024xi32>
      %cst_16 = arith.constant 0.000000e+00 : f32
      %46 = vector.broadcast %cst_16 : f32 to vector<8x1024xf32>
      %47 = arith.select %45, %17, %46 : vector<8x1024xi1>, vector<8x1024xf32>
      %48 = arith.truncf %47 : vector<8x1024xf32> to vector<8x1024xbf16>
      %c0_17 = arith.constant 0 : index
      %c0_18 = arith.constant 0 : index
      %49 = vector.load %arg6[%c0_17, %c0_18] : memref<1024x128xbf16, #tpu.memory_space<vmem>>, vector<1024x128xbf16>
      %cst_19 = arith.constant dense<0.000000e+00> : vector<8x128xf32>
      %50 = tpu.matmul %48, %49, %cst_19 {dimension_numbers = #tpu.dot_dimension_numbers<[1], [0], [0], [1], [0, 0, 1, 1], [], []>} : vector<8x1024xbf16>, vector<1024x128xbf16>, vector<8x128xf32> -> vector<8x128xf32>
      %c0_20 = arith.constant 0 : index
      %c0_21 = arith.constant 0 : index
      %51 = vector.load %arg7[%c0_20, %c0_21] : memref<1x128xf32, #tpu.memory_space<vmem>>, vector<1x128xf32>
      %52 = vector.broadcast %51 : vector<1x128xf32> to vector<8x128xf32>
      %53 = arith.addf %50, %52 : vector<8x128xf32>
      %54 = arith.negf %53 : vector<8x128xf32>
      %55 = math.exp %54 : vector<8x128xf32>
      %cst_22 = arith.constant 1.000000e+00 : f32
      %56 = vector.broadcast %cst_22 : f32 to vector<8x128xf32>
      %57 = arith.addf %56, %55 : vector<8x128xf32>
      %58 = arith.divf %56, %57 : vector<8x128xf32>
      %c0_23 = arith.constant 0 : index
      %c0_24 = arith.constant 0 : index
      %59 = vector.load %arg8[%c0_23, %c0_24] : memref<8x128xf32, #tpu.memory_space<vmem>>, vector<8x128xf32>
      tpu.vector_store %arg8[%c0_23, %c0_24], %58 {strides = array<i32>} : memref<8x128xf32, #tpu.memory_space<vmem>>, vector<8x128xf32>,
    } else {
    }
    return
  }
  func.func @transform_0(%arg0: i32, %arg1: i32, %arg2: memref<1xi32, #tpu.memory_space<smem>>) -> (i32, i32) {
    %c0_i32 = arith.constant 0 : i32
    return %arg0, %arg1 : i32, i32
  }
  func.func @transform_1(%arg0: i32, %arg1: i32, %arg2: memref<1xi32, #tpu.memory_space<smem>>) -> (i32, i32) {
    %c0_i32 = arith.constant 0 : i32
    %c0_i32_0 = arith.constant 0 : i32
    return %arg1, %c0_i32 : i32, i32
  }
  func.func @transform_2(%arg0: i32, %arg1: i32, %arg2: memref<1xi32, #tpu.memory_space<smem>>) -> (i32, i32) {
    %c0_i32 = arith.constant 0 : i32
    %c0_i32_0 = arith.constant 0 : i32
    %c0_i32_1 = arith.constant 0 : i32
    return %c0_i32, %c0_i32_0 : i32, i32
  }
  func.func @transform_3(%arg0: i32, %arg1: i32, %arg2: memref<1xi32, #tpu.memory_space<smem>>) -> (i32, i32) {
    %c0_i32 = arith.constant 0 : i32
    %c0_i32_0 = arith.constant 0 : i32
    %c0_i32_1 = arith.constant 0 : i32
    return %c0_i32, %c0_i32_0 : i32, i32
  }
  func.func @transform_4(%arg0: i32, %arg1: i32, %arg2: memref<1xi32, #tpu.memory_space<smem>>) -> (i32, i32) {
    %c0_i32 = arith.constant 0 : i32
    %c0_i32_0 = arith.constant 0 : i32
    %c0_i32_1 = arith.constant 0 : i32
    return %c0_i32, %c0_i32_0 : i32, i32
  }
  func.func @transform_5(%arg0: i32, %arg1: i32, %arg2: memref<1xi32, #tpu.memory_space<smem>>) -> (i32, i32) {
    %c0_i32 = arith.constant 0 : i32
    %c0_i32_0 = arith.constant 0 : i32
    return %arg0, %c0_i32 : i32, i32
  }
}

</mosaic_0001>

<bundles_post_ra>
// kernel: tpu_custom_call.1
= control target key start
LH: loop header
LB: loop body
LE: loop exit
PB: predicated region body
PF: predicated region fallthrough
CT: control target
= control target key end

     0   :  { %12 = vsyncpa [#allocation6], 0  ;;  %s1942_s0 = inlined_call_operand.<no memory space> [shape: s32[1], index: 0, kind: input, shape index: {}]   ;;  %s1943_s1 = inlined_call_operand.hbm [shape: f32[8,64], index: 1, kind: input, shape index: {}]   ;;  %s1944_s2 = inlined_call_operand.hbm [shape: bf16[64,1024], index: 2, kind: input, shape index: {}]   ;;  %s1945_s3 = inlined_call_operand.vmem [shape: f32[1,1024], index: 3, kind: input, shape index: {}]   ;;  %s1946_s4 = inlined_call_operand.hbm [shape: bf16[1024,128], index: 4, kind: input, shape index: {}]   ;;  %s1947_s5 = inlined_call_operand.vmem [shape: f32[1,128], index: 5, kind: input, shape index: {}]   ;;  %s1948_s6 = inlined_call_operand.hbm [shape: f32[8,128], index: 6, kind: output, shape index: {}]  }
   0x1   :  { %13 = vsyncpa [#allocation9], 0 }
   0x2   :  { %14 = vsyncpa [#allocation7], 0  ;;  %s1740_s21 = smov [#allocation8]   ;;  %s1646_s25 = scalar_lea.hbm %s1944_s2, 4096 }
   0x3   :  { %s30_s22 = sshll.u32 %s1740_s21, 4  ;;  %p1647_p0 = scmp.ne.s32.totalorder %s1944_s2, %s1646_s25  ;;  %s31_s22 = int_to_ptr.vmem [resolvable:$true] %s30_s22 }
   0x4   :  { %p1650_p1 = scmp.lt.u32.totalorder %s1646_s25, %s1944_s2 }
   0x6   :  { %p1652_p2 = pnand %p1650_p1, %p1647_p0 }
   0x8   :  { %1655 = shalt.err (!%p1652_p2)
}
   0x9   :  { %s1656_s30 = scalar_lea.vmem %s31_s22, 4096  ;;  %p1661_p4 = scmp.lt.s32.totalorder %s31_s22, %s31_s22 }
   0xa   :  { %p1657_p3 = scmp.ne.s32.totalorder %s31_s22, %s1656_s30  ;;  %p1662_p5 = scmp.lt.s32.totalorder %s1656_s30, %s1656_s30 }
   0xc   :  { %p1663_p6 = por %p1662_p5, %p1661_p4 }
   0xe   :  { %p1664_p7 = pnand %p1663_p6, %p1657_p3 }
  0x10   :  { %1667 = shalt.err (!%p1664_p7)
}
  0x11   :  { %s1741_s7 = smov 512   ;;  %s1742_s8 = smov 32  }
  0x12   :  { %36 = dma.hbm_to_vmem [thread:$0]  %s1944_s2, 4096, %s31_s22, [#allocation9], %s1741_s7, %s1741_s7, %s1742_s8  }
  0x13   :  { %s1743_s11 = smov [#allocation5]   ;;  %s1744_s13 = smov [#allocation10]  }
  0x14   :  { %s21_s12 = sshll.u32 %s1743_s11, 4  ;;  %s44_s14 = sshll.u32 %s1744_s13, 4  ;;  %s22_s12 = int_to_ptr.vmem [resolvable:$true] %s21_s12  ;;  %s45_s14 = int_to_ptr.vmem [resolvable:$true] %s44_s14 }
  0x15   :  { %s1668_s17 = scalar_lea.hbm %s1943_s1, 128 }
  0x16   :  { %p1669_p8 = scmp.ne.s32.totalorder %s1943_s1, %s1668_s17  ;;  %p1672_p9 = scmp.lt.u32.totalorder %s1668_s17, %s1943_s1 }
  0x18   :  { %p1674_p10 = pnand %p1672_p9, %p1669_p8 }
  0x1a   :  { %1677 = shalt.err (!%p1674_p10)
}
  0x1b   :  { %s1678_s2 = scalar_lea.vmem %s22_s12, 128  ;;  %p1683_p12 = scmp.lt.s32.totalorder %s22_s12, %s22_s12 }
  0x1c   :  { %p1679_p11 = scmp.ne.s32.totalorder %s22_s12, %s1678_s2  ;;  %p1684_p13 = scmp.lt.s32.totalorder %s1678_s2, %s1678_s2 }
  0x1e   :  { %p1685_p0 = por %p1684_p13, %p1683_p12 }
  0x20   :  { %p1686_p1 = pnand %p1685_p0, %p1679_p11 }
  0x22   :  { %1689 = shalt.err (!%p1686_p1)
}
  0x23   :  { %24 = dma.hbm_to_vmem [thread:$0]  %s1943_s1, 128, %s22_s12, [#allocation6]  }
  0x24   :  { %s1690_s26 = scalar_lea.hbm %s1946_s4, 8192 }
  0x25   :  { %p1691_p2 = scmp.ne.s32.totalorder %s1946_s4, %s1690_s26  ;;  %p1694_p3 = scmp.lt.u32.totalorder %s1690_s26, %s1946_s4 }
  0x27   :  { %p1696_p4 = pnand %p1694_p3, %p1691_p2 }
  0x29   :  { %1699 = shalt.err (!%p1696_p4)
}
  0x2a   :  { %s1700_s7 = scalar_lea.vmem %s45_s14, 8192  ;;  %p1705_p6 = scmp.lt.s32.totalorder %s45_s14, %s45_s14 }
  0x2b   :  { %p1701_p5 = scmp.ne.s32.totalorder %s45_s14, %s1700_s7  ;;  %p1706_p7 = scmp.lt.s32.totalorder %s1700_s7, %s1700_s7 }
  0x2d   :  { %p1707_p8 = por %p1706_p7, %p1705_p6 }
  0x2f   :  { %p1708_p9 = pnand %p1707_p8, %p1701_p5 }
  0x31   :  { %1711 = shalt.err (!%p1708_p9)
}
  0x32   :  { %s1745_s1 = smov 64   ;;  %s1746_s8 = smov 4  }
  0x33   :  { %50 = dma.hbm_to_vmem [thread:$0]  %s1946_s4, 8192, %s45_s14, [#allocation9], %s1745_s1, %s1745_s1, %s1746_s8  }
  0x34   :  { %1734 = dma.done.wait [#allocation6], 128  }
  0x35   :  { %1735 = vsyncadd [#allocation6], 4294967168 }
  0x36   :  { %1736 = dma.done.wait [#allocation9], 12288  }
  0x37   :  { %1737 = vsyncadd [#allocation9], 4294955008  ;;  %v1747_v0 = vmov 0   ;;  %v129_v1 = vld [vmem:[#allocation8] sm:$0xff]  ;;  %v130_v3 = vld [vmem:[#allocation8 + $0x8] sm:$0xff]  ;;  %vm321_vm0 = vcmask 523264  }
  0x38   :  { %357 = vmatprep.mubr.bf16.mxu0 %v1747_v0  ;;  %398 = vmatprep.mubr.bf16.mxu1 %v1747_v0  ;;  %v133_v2 = vld [vmem:[#allocation8 + $0x20] sm:$0xff]  ;;  %v134_v5 = vld [vmem:[#allocation8 + $0x28] sm:$0xff]  ;;  %v127_v31 = vld [vmem:[#allocation5] sm:$0xff]  ;;  %s546_s12 = sadd.s32 1, %s1942_s0 }
  0x39   :  { %v1356_v4 = vcombine.high %v129_v1, %v133_v2  ;;  %v1355_v6 = vcombine.low %v129_v1, %v133_v2  ;;  %v137_v7 = vld [vmem:[#allocation8 + $0x40] sm:$0xff]  ;;  %v1358_v9 = vcombine.high %v130_v3, %v134_v5  ;;  %v1357_v10 = vcombine.low %v130_v3, %v134_v5  ;;  %v138_v12 = vld [vmem:[#allocation8 + $0x48] sm:$0xff]  ;;  %v131_v32 = vld [vmem:[#allocation8 + $0x10] sm:$0xff]  ;;  %s547_s13 = smul.u32 2654435769, %s546_s12 }
  0x3a   :  { %v141_v8 = vld [vmem:[#allocation8 + $0x60] sm:$0xff]  ;;  %v142_v13 = vld [vmem:[#allocation8 + $0x68] sm:$0xff]  ;;  %v135_v33 = vld [vmem:[#allocation8 + $0x30] sm:$0xff]  ;;  %v128_v43 = vpack.c.bf16 %v127_v31, %v127_v31 }
  0x3b   :  { %v1364_v11 = vcombine.high %v137_v7, %v141_v8  ;;  %v145_v14 = vld [vmem:[#allocation8 + $0x80] sm:$0xff]  ;;  %325 = vmatprep.subr.bf16.mxu0 %v1356_v4  ;;  %v1366_v15 = vcombine.high %v138_v12, %v142_v13  ;;  %v146_v17 = vld [vmem:[#allocation8 + $0x88] sm:$0xff]  ;;  %366 = vmatprep.subr.bf16.mxu1 %v1358_v9  ;;  %v1363_v19 = vcombine.low %v137_v7, %v141_v8  ;;  %v132_v34 = vld [vmem:[#allocation8 + $0x18] sm:$0xff] }
  0x3c   :  { %v149_v16 = vld [vmem:[#allocation8 + $0xa0] sm:$0xff]  ;;  %v150_v18 = vld [vmem:[#allocation8 + $0xa8] sm:$0xff]  ;;  %326 = vmatpush1.bf16.msra.mxu0 %v1355_v6  ;;  %367 = vmatpush1.bf16.msra.mxu1 %v1357_v10  ;;  %v1365_v20 = vcombine.low %v138_v12, %v142_v13  ;;  %v136_v35 = vld [vmem:[#allocation8 + $0x38] sm:$0xff]  ;;  %v1360_v39 = vcombine.high %v131_v32, %v135_v33  ;;  %v1359_v45 = vcombine.low %v131_v32, %v135_v33 }
  0x3d   :  { %327 = vmatprep.subr.bf16.mxu0 %v1364_v11  ;;  %v1372_v21 = vcombine.high %v145_v14, %v149_v16  ;;  %368 = vmatprep.subr.bf16.mxu1 %v1366_v15  ;;  %v1374_v22 = vcombine.high %v146_v17, %v150_v18  ;;  %v153_v23 = vld [vmem:[#allocation8 + $0xc0] sm:$0xff]  ;;  %v154_v25 = vld [vmem:[#allocation8 + $0xc8] sm:$0xff]  ;;  %v1371_v27 = vcombine.low %v145_v14, %v149_v16  ;;  %v139_v37 = vld [vmem:[#allocation8 + $0x50] sm:$0xff] }
  0x3e   :  { %v157_v24 = vld [vmem:[#allocation8 + $0xe0] sm:$0xff]  ;;  %v158_v26 = vld [vmem:[#allocation8 + $0xe8] sm:$0xff]  ;;  %v1373_v28 = vcombine.low %v146_v17, %v150_v18  ;;  %v143_v40 = vld [vmem:[#allocation8 + $0x70] sm:$0xff]  ;;  %v1362_v41 = vcombine.high %v132_v34, %v136_v35  ;;  %v1361_v47 = vcombine.low %v132_v34, %v136_v35 }
  0x3f   :  { %v1380_v29 = vcombine.high %v153_v23, %v157_v24  ;;  %v1382_v30 = vcombine.high %v154_v25, %v158_v26  ;;  %v1379_v36 = vcombine.low %v153_v23, %v157_v24  ;;  %v1381_v38 = vcombine.low %v154_v25, %v158_v26  ;;  %v140_v42 = vld [vmem:[#allocation8 + $0x58] sm:$0xff]  ;;  %v147_v46 = vld [vmem:[#allocation8 + $0x90] sm:$0xff]  ;;  %v1578_v3 = vld [vmem:[#allocation10 + $0x40] sm:$0xff]  }
  0x40   :  { %328 = vmatpush1.bf16.msra.mxu0 %v1363_v19  ;;  %369 = vmatpush1.bf16.msra.mxu1 %v1365_v20  ;;  %v144_v44 = vld [vmem:[#allocation8 + $0x78] sm:$0xff]  ;;  %v1368_v48 = vcombine.high %v139_v37, %v143_v40  ;;  %v151_v49 = vld [vmem:[#allocation8 + $0xb0] sm:$0xff]  ;;  %v1367_v53 = vcombine.low %v139_v37, %v143_v40  ;;  %v1579_v5 = vld [vmem:[#allocation10 + $0xc0] sm:$0xff]   ;;  %v71_v37 = vlaneseq }
  0x41   :  { %329 = vmatprep.subr.bf16.mxu0 %v1372_v21  ;;  %370 = vmatprep.subr.bf16.mxu1 %v1374_v22  ;;  %v1370_v50 = vcombine.high %v140_v42, %v144_v44  ;;  %v148_v51 = vld [vmem:[#allocation8 + $0x98] sm:$0xff]  ;;  %v155_v54 = vld [vmem:[#allocation8 + $0xd0] sm:$0xff]  ;;  %v1369_v55 = vcombine.low %v140_v42, %v144_v44  ;;  %v1376_v56 = vcombine.high %v147_v46, %v151_v49  ;;  %v1580_v6 = vld [vmem:[#allocation10] sm:$0xff]  }
  0x42   :  { %v152_v52 = vld [vmem:[#allocation8 + $0xb8] sm:$0xff]  ;;  %v159_v57 = vld [vmem:[#allocation8 + $0xf0] sm:$0xff]  ;;  %v1375_v61 = vcombine.low %v147_v46, %v151_v49  ;;  %v1581_v7 = vld [vmem:[#allocation10 + $0x80] sm:$0xff]   ;;  %v1838_v46 = vstv %s547_s13 }
  0x43   :  { %v1378_v58 = vcombine.high %v148_v51, %v152_v52  ;;  %v156_v59 = vld [vmem:[#allocation8 + $0xd8] sm:$0xff]  ;;  %v1377_v62 = vcombine.low %v148_v51, %v152_v52  ;;  %v1384_v63 = vcombine.high %v155_v54, %v159_v57  ;;  %v1383_v2 = vcombine.low %v155_v54, %v159_v57  ;;  %v1583_v8 = vld [vmem:[#allocation10 + $0xc8] sm:$0xff]   ;;  %v1586_v11 = vld [vmem:[#allocation10 + $0x50] sm:$0xff]  }
  0x44   :  { %330 = vmatpush1.bf16.msra.mxu0 %v1371_v27  ;;  %371 = vmatpush1.bf16.msra.mxu1 %v1373_v28  ;;  %v160_v60 = vld [vmem:[#allocation8 + $0xf8] sm:$0xff]  ;;  %v1584_v9 = vld [vmem:[#allocation10 + $0x8] sm:$0xff]   ;;  %v1587_v12 = vld [vmem:[#allocation10 + $0xd0] sm:$0xff]  }
  0x45   :  { %331 = vmatprep.subr.bf16.mxu0 %v1380_v29  ;;  %372 = vmatprep.subr.bf16.mxu1 %v1382_v30  ;;  %v1386_v1 = vcombine.high %v156_v59, %v160_v60  ;;  %v1385_v4 = vcombine.low %v156_v59, %v160_v60  ;;  %v1585_v10 = vld [vmem:[#allocation10 + $0x88] sm:$0xff]   ;;  %v1588_v13 = vld [vmem:[#allocation10 + $0x10] sm:$0xff]   ;;  %v1590_v15 = vld [vmem:[#allocation10 + $0x58] sm:$0xff]  }
  0x46   :  { %v1589_v14 = vld [vmem:[#allocation10 + $0x90] sm:$0xff]   ;;  %v1591_v16 = vld [vmem:[#allocation10 + $0xd8] sm:$0xff]   ;;  %v1594_v19 = vld [vmem:[#allocation10 + $0x60] sm:$0xff]  }
  0x47   :  { %v1592_v17 = vld [vmem:[#allocation10 + $0x18] sm:$0xff]   ;;  %v1595_v20 = vld [vmem:[#allocation10 + $0xe0] sm:$0xff]   ;;  %v1598_v23 = vld [vmem:[#allocation10 + $0x68] sm:$0xff]  }
  0x48   :  { %332 = vmatpush1.bf16.msra.mxu0 %v1379_v36  ;;  %373 = vmatpush1.bf16.msra.mxu1 %v1381_v38  ;;  %v1593_v18 = vld [vmem:[#allocation10 + $0x98] sm:$0xff]   ;;  %v1596_v21 = vld [vmem:[#allocation10 + $0x20] sm:$0xff]   ;;  %v1599_v24 = vld [vmem:[#allocation10 + $0xe8] sm:$0xff]   ;;  %v1828_v38 = vshrl.u32 %v71_v37, 7 }
  0x49   :  { %407 = vmatprep.subr.bf16.mxu0 %v1360_v39  ;;  %448 = vmatprep.subr.bf16.mxu1 %v1362_v41  ;;  %v1597_v22 = vld [vmem:[#allocation10 + $0xa0] sm:$0xff]   ;;  %v1600_v25 = vld [vmem:[#allocation10 + $0x28] sm:$0xff]   ;;  %v1602_v27 = vld [vmem:[#allocation10 + $0x70] sm:$0xff]   ;;  %v529_v39 = vand.u32 127, %v71_v37 }
  0x4a   :  { %v1601_v26 = vld [vmem:[#allocation10 + $0xa8] sm:$0xff]   ;;  %v1603_v28 = vld [vmem:[#allocation10 + $0xf0] sm:$0xff]   ;;  %v1606_v31 = vld [vmem:[#allocation10 + $0x78] sm:$0xff]   ;;  %v1834_v41 = vshll.u32 %v1828_v38, 10  ;;  %v81_v37 = vsub.s32 2, %v1828_v38 }
  0x4b   :  { %1387 = vmatmul.mubr.msk.bf16.vlgmr.msra.gmra.mrb[0].mxu0 %vm321_vm0, %v128_v43  ;;  %1388 = vmatmul.mubr.msk.bf16.vlgmr.msra.gmra.mrb[0].mxu1 %vm321_vm0, %v128_v43  ;;  %v1604_v29 = vld [vmem:[#allocation10 + $0x30] sm:$0xff]   ;;  %v1607_v32 = vld [vmem:[#allocation10 + $0xf8] sm:$0xff]   ;;  %v1610_v35 = vld [vmem:[#allocation10 + $0x140] sm:$0xff]   ;;  %v530_v40 = vadd.s32 128, %v529_v39  ;;  %v532_v42 = vadd.s32 384, %v529_v39  ;;  %v534_v60 = vadd.s32 640, %v529_v39 }
  0x4c   :  { %408 = vmatpush1.bf16.msra.mxu0 %v1359_v45  ;;  %449 = vmatpush1.bf16.msra.mxu1 %v1361_v47  ;;  %v1605_v30 = vld [vmem:[#allocation10 + $0xb0] sm:$0xff]   ;;  %v1608_v33 = vld [vmem:[#allocation10 + $0x38] sm:$0xff]   ;;  %v1611_v36 = vld [vmem:[#allocation10 + $0x1c0] sm:$0xff]   ;;  %v538_v47 = vor.u32 %v1834_v41, %v529_v39 }
  0x4d   :  { %409 = vmatprep.subr.bf16.mxu0 %v1368_v48  ;;  %450 = vmatprep.subr.bf16.mxu1 %v1370_v50  ;;  %v1609_v34 = vld [vmem:[#allocation10 + $0xb8] sm:$0xff]   ;;  %v539_v44 = vor.u32 %v1834_v41, %v530_v40  ;;  %v541_v45 = vor.u32 %v1834_v41, %v532_v42 }
  0x4e   :  { %439 = vmatprep.mubr.bf16.mxu0 %v1747_v0  ;;  %480 = vmatprep.mubr.bf16.mxu1 %v1747_v0  ;;  %v1582_v0 = vld [vmem:[#allocation10 + $0x48] sm:$0xff]   ;;  %v549_v51 = vadd.s32 %v1838_v46, %v538_v47 }
  0x4f   :  { %v550_v49 = vadd.s32 %v1838_v46, %v539_v44  ;;  %v552_v50 = vadd.s32 %v1838_v46, %v541_v45 }
  0x50   :  { %410 = vmatpush1.bf16.msra.mxu0 %v1367_v53  ;;  %451 = vmatpush1.bf16.msra.mxu1 %v1369_v55  ;;  %v557_v55 = vshrl.u32 %v549_v51, 16 }
  0x51   :  { %411 = vmatprep.subr.bf16.mxu0 %v1376_v56  ;;  %452 = vmatprep.subr.bf16.mxu1 %v1378_v58  ;;  %v558_v53 = vshrl.u32 %v550_v49, 16  ;;  %v560_v54 = vshrl.u32 %v552_v50, 16 }
  0x52   :  { %v565_v59 = vxor.u32 %v557_v55, %v549_v51 }
  0x53   :  { %v566_v57 = vxor.u32 %v558_v53, %v550_v49  ;;  %v568_v58 = vxor.u32 %v560_v54, %v552_v50 }
  0x54   :  { %412 = vmatpush1.bf16.msra.mxu0 %v1375_v61  ;;  %453 = vmatpush1.bf16.msra.mxu1 %v1377_v62  ;;  %v536_v61 = vadd.s32 896, %v529_v39 }
  0x55   :  { %413 = vmatprep.subr.bf16.mxu0 %v1384_v63  ;;  %454 = vmatprep.subr.bf16.mxu1 %v1386_v1  ;;  %v574_v63 = vmul.u32 2146121005, %v566_v57  ;;  %v576_v1 = vmul.u32 2146121005, %v568_v58 }
  0x58   :  { %414 = vmatpush1.bf16.msra.mxu0 %v1383_v2  ;;  %455 = vmatpush1.bf16.msra.mxu1 %v1385_v4  ;;  %v573_v2 = vmul.u32 2146121005, %v565_v59  ;;  %v545_v4 = vor.u32 %v1834_v41, %v536_v61 }
  0x59   :  { %1481 = vmatprep.subr.bf16.mxu0 %v1578_v3  ;;  %1503 = vmatprep.subr.bf16.mxu1 %v1579_v5  ;;  %v543_v3 = vor.u32 %v1834_v41, %v534_v60 }
  0x5b   :  { %1389 = vmatmul.mubr.msk.bf16.vlgmr.msra.gmra.mrb[4].mxu0 %vm321_vm0, %v128_v43  ;;  %1390 = vmatmul.mubr.msk.bf16.vlgmr.msra.gmra.mrb[4].mxu1 %vm321_vm0, %v128_v43  ;;  %v531_v43 = vadd.s32 256, %v529_v39 }
  0x5c   :  { %1482 = vmatpush3.bf16.msra.mxu0 %v1580_v6  ;;  %1504 = vmatpush3.bf16.msra.mxu1 %v1581_v7  ;;  %v582_v6 = vshrl.u32 %v574_v63, 15  ;;  %v584_v7 = vshrl.u32 %v576_v1, 15 }
  0x5d   :  { %1483 = vmatprep.subr.bf16.mxu0 %v1582_v0  ;;  %1505 = vmatprep.subr.bf16.mxu1 %v1583_v8  ;;  %v540_v48 = vor.u32 %v1834_v41, %v531_v43  ;;  %v581_v0 = vshrl.u32 %v573_v2, 15  ;;  %v554_v8 = vadd.s32 %v1838_v46, %v543_v3  ;;  %v85_v43 = vsub.s32 3, %v1828_v38 }
  0x5f   :  { %v551_v52 = vadd.s32 %v1838_v46, %v540_v48 }
  0x60   :  { %1484 = vmatpush3.bf16.msra.mxu0 %v1584_v9  ;;  %1506 = vmatpush3.bf16.msra.mxu1 %v1585_v10  ;;  %v556_v9 = vadd.s32 %v1838_v46, %v545_v4 }
  0x61   :  { %1485 = vmatprep.subr.bf16.mxu0 %v1586_v11  ;;  %1507 = vmatprep.subr.bf16.mxu1 %v1587_v12  ;;  %v559_v56 = vshrl.u32 %v551_v52, 16  ;;  %v590_v11 = vxor.u32 %v582_v6, %v574_v63  ;;  %v592_v12 = vxor.u32 %v584_v7, %v576_v1 }
  0x63   :  { %v567_v62 = vxor.u32 %v559_v56, %v551_v52 }
  0x64   :  { %1486 = vmatpush3.bf16.msra.mxu0 %v1588_v13  ;;  %1508 = vmatpush3.bf16.msra.mxu1 %v1589_v14  ;;  %v589_v13 = vxor.u32 %v581_v0, %v573_v2  ;;  %v562_v14 = vshrl.u32 %v554_v8, 16 }
  0x65   :  { %1487 = vmatprep.subr.bf16.mxu0 %v1590_v15  ;;  %1509 = vmatprep.subr.bf16.mxu1 %v1591_v16  ;;  %v575_v5 = vmul.u32 2146121005, %v567_v62  ;;  %v564_v15 = vshrl.u32 %v556_v9, 16 }
  0x67   :  { %v583_v10 = vshrl.u32 %v575_v5, 15 }
  0x68   :  { %1488 = vmatpush3.bf16.msra.mxu0 %v1592_v17  ;;  %1510 = vmatpush3.bf16.msra.mxu1 %v1593_v18  ;;  %v598_v17 = vmul.u32 2221713035, %v590_v11  ;;  %v600_v18 = vmul.u32 2221713035, %v592_v12 }
  0x69   :  { %1489 = vmatprep.subr.bf16.mxu0 %v1594_v19  ;;  %1511 = vmatprep.subr.bf16.mxu1 %v1595_v20  ;;  %v591_v16 = vxor.u32 %v583_v10, %v575_v5  ;;  %v597_v19 = vmul.u32 2221713035, %v589_v13  ;;  %v570_v20 = vxor.u32 %v562_v14, %v554_v8 }
  0x6c   :  { %1490 = vmatpush3.bf16.msra.mxu0 %v1596_v21  ;;  %1512 = vmatpush3.bf16.msra.mxu1 %v1597_v22  ;;  %v572_v21 = vxor.u32 %v564_v15, %v556_v9  ;;  %v533_v22 = vadd.s32 512, %v529_v39 }
  0x6d   :  { %1491 = vmatprep.subr.bf16.mxu0 %v1598_v23  ;;  %1513 = vmatprep.subr.bf16.mxu1 %v1599_v24  ;;  %v599_v23 = vmul.u32 2221713035, %v591_v16  ;;  %v535_v24 = vadd.s32 768, %v529_v39  ;;  %v77_v39 = vsub.s32 1, %v1828_v38 }
  0x70   :  { %1492 = vmatpush3.bf16.msra.mxu0 %v1600_v25  ;;  %1514 = vmatpush3.bf16.msra.mxu1 %v1601_v26  ;;  %v606_v25 = vshrl.u32 %v598_v17, 16  ;;  %v608_v26 = vshrl.u32 %v600_v18, 16 }
  0x71   :  { %1493 = vmatprep.subr.bf16.mxu0 %v1602_v27  ;;  %1515 = vmatprep.subr.bf16.mxu1 %v1603_v28  ;;  %v605_v27 = vshrl.u32 %v597_v19, 16  ;;  %v578_v28 = vmul.u32 2146121005, %v570_v20 }
  0x73   :  { %v613_v40 = vxor.u32 %v605_v27, %v597_v19  ;;  %v586_v42 = vshrl.u32 %v578_v28, 15 }
  0x74   :  { %1494 = vmatpush3.bf16.msra.mxu0 %v1604_v29  ;;  %1516 = vmatpush3.bf16.msra.mxu1 %v1605_v30  ;;  %v580_v29 = vmul.u32 2146121005, %v572_v21  ;;  %v542_v30 = vor.u32 %v1834_v41, %v533_v22  ;;  %v1612_v21 = vld [vmem:[#allocation10 + $0x100] sm:$0xff]  }
  0x75   :  { %1495 = vmatprep.subr.bf16.mxu0 %v1606_v31  ;;  %1517 = vmatprep.subr.bf16.mxu1 %v1607_v32  ;;  %v607_v31 = vshrl.u32 %v599_v23, 16  ;;  %v544_v32 = vor.u32 %v1834_v41, %v535_v24  ;;  %v621_v53 = vshrl.u32 %v613_v40, 8  ;;  %v594_v54 = vxor.u32 %v586_v42, %v578_v28  ;;  %v1619_v42 = vld [vmem:[#allocation10 + $0x1d0] sm:$0xff]  }
  0x76   :  { %v588_v44 = vshrl.u32 %v580_v29, 15  ;;  %v553_v41 = vadd.s32 %v1838_v46, %v542_v30 }
  0x77   :  { %v615_v45 = vxor.u32 %v607_v31, %v599_v23  ;;  %v555_v47 = vadd.s32 %v1838_v46, %v544_v32  ;;  %vm1875_vm3 = vcmp.ge.s32.totalorder %v621_v53, 8388608  ;;  %v602_v7 = vmul.u32 2221713035, %v594_v54  ;;  %v1616_v31 = vld [vmem:[#allocation10 + $0x108] sm:$0xff]  }
  0x78   :  { %1496 = vmatpush3.bf16.msra.mxu0 %v1608_v33  ;;  %1518 = vmatpush3.bf16.msra.mxu1 %v1609_v34  ;;  %v73_v33 = vsub.s32 0, %v1828_v38  ;;  %v614_v34 = vxor.u32 %v606_v25, %v598_v17  ;;  %v596_v56 = vxor.u32 %v588_v44, %v580_v29  ;;  %v561_v57 = vshrl.u32 %v553_v41, 16  ;;  %vm1459_vm7 = vmpackc.low %vm1875_vm3, %vm1875_vm3  ;;  %v1613_v25 = vld [vmem:[#allocation10 + $0x180] sm:$0xff]   ;;  %v1615_v29 = vld [vmem:[#allocation10 + $0x1c8] sm:$0xff]  }
  0x79   :  { %1525 = vmatprep.subr.bf16.mxu0 %v1610_v35  ;;  %1547 = vmatprep.subr.bf16.mxu1 %v1611_v36  ;;  %v616_v35 = vxor.u32 %v608_v26, %v600_v18  ;;  %v1856_v36 = vld [vmem:[%s1945_s3] sm:$0xff]  ;;  %v623_v59 = vshrl.u32 %v615_v45, 8  ;;  %v563_v60 = vshrl.u32 %v555_v47, 16  ;;  %v610_v22 = vshrl.u32 %v602_v7, 16  ;;  %v1614_v26 = vld [vmem:[#allocation10 + $0x148] sm:$0xff]   ;;  %v1620_v44 = vld [vmem:[#allocation10 + $0x110] sm:$0xff]  }
  0x7a   :  { %v74_v48 = vrot.slane %v1856_v36, %v73_v33  ;;  %v622_v49 = vshrl.u32 %v614_v34, 8  ;;  %v82_v51 = vrot.slane %v1856_v36, %v81_v37  ;;  %v78_v52 = vrot.slane %v1856_v36, %v77_v39  ;;  %v1617_v34 = vld [vmem:[#allocation10 + $0x188] sm:$0xff]  }
  0x7b   :  { %v624_v50 = vshrl.u32 %v616_v35, 8  ;;  %v86_v55 = vrot.slane %v1856_v36, %v85_v43  ;;  %v604_v11 = vmul.u32 2221713035, %v596_v56  ;;  %v569_v12 = vxor.u32 %v561_v57, %v553_v41  ;;  %v1618_v35 = vld [vmem:[#allocation10 + $0x150] sm:$0xff]   ;;  %v1624_v57 = vld [vmem:[#allocation10 + $0x118] sm:$0xff]  }
  0x7c   :  { %vm1867_vm1 = vcmp.ge.s32.totalorder %v622_v49, 8388608  ;;  %vm1882_vm5 = vcmp.ge.s32.totalorder %v623_v59, 8388608  ;;  %v571_v17 = vxor.u32 %v563_v60, %v555_v47  ;;  %v93_v32 = vsub.s32 5, %v1828_v38  ;;  %v1621_v47 = vld [vmem:[#allocation10 + $0x190] sm:$0xff]  }
  0x7d   :  { %vm1871_vm2 = vcmp.ge.s32.totalorder %v624_v50, 8388608  ;;  %vm1456_vm4 = vmpackc.low %vm1867_vm1, %vm1867_vm1  ;;  %v612_v27 = vshrl.u32 %v604_v11, 16  ;;  %v577_v28 = vmul.u32 2146121005, %v569_v12  ;;  %v618_v33 = vxor.u32 %v610_v22, %v602_v7  ;;  %v1629_v12 = vld [vmem:[#allocation10 + $0x1a0] sm:$0xff]   ;;  %v1633_v22 = vld [vmem:[#allocation10 + $0x1a8] sm:$0xff]  }
  0x7e   :  { %vm1462_vm6 = vmpackc.low %vm1871_vm2, %vm1871_vm2  ;;  %v579_v30 = vmul.u32 2146121005, %v571_v17  ;;  %v101_v37 = vsub.s32 7, %v1828_v38  ;;  %v94_v41 = vrot.slane %v1856_v36, %v93_v32  ;;  %v1631_v17 = vld [vmem:[#allocation10 + $0x1e8] sm:$0xff]   ;;  %v1639_v32 = vld [vmem:[#allocation10 + $0x1f8] sm:$0xff]  }
  0x7f   :  { %vm1465_vm8 = vmpackc.low %vm1882_vm5, %vm1882_vm5  ;;  %v620_v39 = vxor.u32 %v612_v27, %v604_v11  ;;  %v585_v40 = vshrl.u32 %v577_v28, 15  ;;  %v626_v45 = vshrl.u32 %v618_v33, 8  ;;  %v97_v11 = vsub.s32 6, %v1828_v38  ;;  %v1636_v27 = vld [vmem:[#allocation10 + $0x130] sm:$0xff]  }
  0x80   :  { %v587_v43 = vshrl.u32 %v579_v30, 15  ;;  %v102_v49 = vrot.slane %v1856_v36, %v101_v37  ;;  %v1641_v37 = vld [vmem:[#allocation10 + $0x1b8] sm:$0xff]  }
  0x81   :  { %v628_v50 = vshrl.u32 %v620_v39, 8  ;;  %vm1909_vm9 = vcmp.ge.s32.totalorder %v626_v45, 8388608 }
  0x82   :  { %v595_v54 = vxor.u32 %v587_v43, %v579_v30  ;;  %vm1468_vm11 = vmpackc.low %vm1909_vm9, %vm1909_vm9  ;;  %v1638_v30 = vld [vmem:[#allocation10 + $0x178] sm:$0xff]  }
  0x83   :  { %vm1913_vm10 = vcmp.ge.s32.totalorder %v628_v50, 8388608 }
  0x84   :  { %vm1474_vm12 = vmpackc.low %vm1913_vm10, %vm1913_vm10 }
 0x11e   :  { %v359_v58 = vpop.f32.mrb[0].mxu0  ;;  %v400_v62 = vpop.f32.mrb[0].mxu1 }
 0x11f   :  { %v489_v61 = vadd.f32 %v359_v58, %v74_v48  ;;  %v361_v46 = vpop.f32.mrb[1].mxu0  ;;  %v491_v2 = vadd.f32 %v400_v62, %v82_v51  ;;  %v402_v4 = vpop.f32.mrb[1].mxu1  ;;  %v1622_v48 = vld [vmem:[#allocation10 + $0x158] sm:$0xff]   ;;  %v593_v51 = vxor.u32 %v585_v40, %v577_v28 }
 0x120   :  { %v490_v3 = vadd.f32 %v361_v46, %v78_v52  ;;  %v363_v5 = vpop.f32.mrb[2].mxu0  ;;  %v492_v8 = vadd.f32 %v402_v4, %v86_v55  ;;  %v404_v9 = vpop.f32.mrb[2].mxu1  ;;  %v1623_v52 = vld [vmem:[#allocation10 + $0x1d8] sm:$0xff]   ;;  %v1626_v46 = vld [vmem:[#allocation10 + $0x160] sm:$0xff]  }
 0x121   :  { %v516_v0 = vmax.f32 %v489_v61, 0.0  ;;  %v364_v10 = vpop.f32.mrb[3].mxu0  ;;  %v518_v13 = vmax.f32 %v491_v2, 0.0  ;;  %v405_v15 = vpop.f32.mrb[3].mxu1  ;;  %v1625_v58 = vld [vmem:[#allocation10 + $0x198] sm:$0xff]   ;;  %v1627_v5 = vld [vmem:[#allocation10 + $0x1e0] sm:$0xff]  }
 0x122   :  { %v517_v14 = vmax.f32 %v490_v3, 0.0  ;;  %v519_v18 = vmax.f32 %v492_v8, 0.0  ;;  %v601_v4 = vmul.u32 2221713035, %v593_v51  ;;  %v1628_v9 = vld [vmem:[#allocation10 + $0x120] sm:$0xff]  }
 0x123   :  { %v1466_v19 = vpack.c.bf16 %v518_v13, %v518_v13  ;;  %v1460_v23 = vpack.c.bf16 %v516_v0, %v516_v0  ;;  %v603_v0 = vmul.u32 2221713035, %v595_v54  ;;  %v89_v13 = vsub.s32 4, %v1828_v38  ;;  %v1635_v38 = vld [vmem:[#allocation10 + $0x1f0] sm:$0xff]  }
 0x124   :  { %v1457_v20 = vpack.c.bf16 %v517_v14, %v517_v14  ;;  %v1463_v24 = vpack.c.bf16 %v519_v18, %v519_v18  ;;  %v1630_v14 = vld [vmem:[#allocation10 + $0x168] sm:$0xff]   ;;  %v609_v16 = vshrl.u32 %v601_v4, 16 }
 0x125   :  { %v611_v18 = vshrl.u32 %v603_v0, 16 }
 0x126   :  { %1458 = vmatprep.mubr.msk.bf16.mxu0 %vm1456_vm4, %v1457_v20  ;;  %1464 = vmatprep.mubr.msk.bf16.mxu1 %vm1462_vm6, %v1463_v24  ;;  %v98_v20 = vrot.slane %v1856_v36, %v97_v11  ;;  %v617_v24 = vxor.u32 %v609_v16, %v601_v4 }
 0x127   :  { %1461 = vmatmul.mubr.msk.bf16.vlgmr.msra.gmra.mrb[8].mxu0 %vm1459_vm7, %v1460_v23  ;;  %1467 = vmatmul.mubr.msk.bf16.vlgmr.msra.gmra.mrb[8].mxu1 %vm1465_vm8, %v1466_v19  ;;  %v1632_v19 = vld [vmem:[#allocation10 + $0x128] sm:$0xff]   ;;  %v1634_v23 = vld [vmem:[#allocation10 + $0x170] sm:$0xff]  }
 0x128   :  { %1526 = vmatpush3.bf16.msra.mxu0 %v1612_v21  ;;  %1548 = vmatpush3.bf16.msra.mxu1 %v1613_v25  ;;  %v90_v21 = vrot.slane %v1856_v36, %v89_v13  ;;  %v619_v25 = vxor.u32 %v611_v18, %v603_v0 }
 0x129   :  { %1527 = vmatprep.subr.bf16.mxu0 %v1614_v26  ;;  %1549 = vmatprep.subr.bf16.mxu1 %v1615_v29  ;;  %v1637_v29 = vld [vmem:[#allocation10 + $0x1b0] sm:$0xff]  }
 0x12a   :  { %v627_v33 = vshrl.u32 %v619_v25, 8 }
 0x12c   :  { %1528 = vmatpush3.bf16.msra.mxu0 %v1616_v31  ;;  %1550 = vmatpush3.bf16.msra.mxu1 %v1617_v34  ;;  %v625_v31 = vshrl.u32 %v617_v24, 8  ;;  %v1640_v34 = vld [vmem:[#allocation10 + $0x138] sm:$0xff]   ;;  %vm635_vm14 = vcmp.ge.s32.totalorder %v627_v33, 8388608 }
 0x12d   :  { %1529 = vmatprep.subr.bf16.mxu0 %v1618_v35  ;;  %1551 = vmatprep.subr.bf16.mxu1 %v1619_v42  ;;  %vm1477_vm0 = vmpackc.low %vm635_vm14, %vm635_vm14 }
 0x12e   :  { %v441_v53 = vpop.f32.mrb[4].mxu0  ;;  %v482_v56 = vpop.f32.mrb[4].mxu1  ;;  %vm633_vm13 = vcmp.ge.s32.totalorder %v625_v31, 8388608 }
 0x12f   :  { %v443_v55 = vpop.f32.mrb[5].mxu0  ;;  %v484_v61 = vpop.f32.mrb[5].mxu1  ;;  %v495_v26 = vadd.f32 %v482_v56, %v98_v20  ;;  %v493_v28 = vadd.f32 %v441_v53, %v90_v21  ;;  %vm1471_vm15 = vmpackc.low %vm633_vm13, %vm633_vm13 }
 0x130   :  { %1530 = vmatpush3.bf16.msra.mxu0 %v1620_v44  ;;  %v494_v59 = vadd.f32 %v443_v55, %v94_v41  ;;  %v445_v60 = vpop.f32.mrb[6].mxu0  ;;  %1552 = vmatpush3.bf16.msra.mxu1 %v1621_v47  ;;  %v496_v1 = vadd.f32 %v484_v61, %v102_v49  ;;  %v486_v2 = vpop.f32.mrb[6].mxu1  ;;  %v1391_v44 = vld [vmem:[%s1947_s5] ss:$0 sm:$0xff]  ;;  %s1748_s5 = smov [#allocation11]  }
 0x131   :  { %1531 = vmatprep.subr.bf16.mxu0 %v1622_v48  ;;  %v446_v63 = vpop.f32.mrb[7].mxu0  ;;  %1553 = vmatprep.subr.bf16.mxu1 %v1623_v52  ;;  %v487_v7 = vpop.f32.mrb[7].mxu1  ;;  %v522_v36 = vmax.f32 %v495_v26, 0.0  ;;  %v520_v35 = vmax.f32 %v493_v28, 0.0  ;;  %s1345_s16 = sshll.u32 %s1748_s5, 4  ;;  %s1346_s16 = int_to_ptr.vmem [resolvable:$true] %s1345_s16 }
 0x132   :  { %v521_v6 = vmax.f32 %v494_v59, 0.0  ;;  %v523_v8 = vmax.f32 %v496_v1, 0.0  ;;  %s1712_s17 = scalar_lea.vmem %s1346_s16, 128  ;;  %p1717_p11 = scmp.lt.s32.totalorder %s1346_s16, %s1346_s16 }
 0x133   :  { %v1478_v39 = vpack.c.bf16 %v522_v36, %v522_v36  ;;  %v1472_v40 = vpack.c.bf16 %v520_v35, %v520_v35  ;;  %p1713_p10 = scmp.ne.s32.totalorder %s1346_s16, %s1712_s17  ;;  %p1718_p12 = scmp.lt.s32.totalorder %s1712_s17, %s1712_s17 }
 0x134   :  { %1532 = vmatpush3.bf16.msra.mxu0 %v1624_v57  ;;  %v1469_v10 = vpack.c.bf16 %v521_v6, %v521_v6  ;;  %1554 = vmatpush3.bf16.msra.mxu1 %v1625_v58  ;;  %v1475_v15 = vpack.c.bf16 %v523_v8, %v523_v8 }
 0x135   :  { %1533 = vmatprep.subr.bf16.mxu0 %v1626_v46  ;;  %1555 = vmatprep.subr.bf16.mxu1 %v1627_v5  ;;  %p1719_p13 = por %p1718_p12, %p1717_p11 }
 0x136   :  { %1470 = vmatprep.mubr.msk.bf16.mxu0 %vm1468_vm11, %v1469_v10  ;;  %1476 = vmatprep.mubr.msk.bf16.mxu1 %vm1474_vm12, %v1475_v15 }
 0x137   :  { %p1720_p0 = pnand %p1719_p13, %p1713_p10 }
 0x138   :  { %1534 = vmatpush3.bf16.msra.mxu0 %v1628_v9  ;;  %1556 = vmatpush3.bf16.msra.mxu1 %v1629_v12 }
 0x139   :  { %1535 = vmatprep.subr.bf16.mxu0 %v1630_v14  ;;  %1557 = vmatprep.subr.bf16.mxu1 %v1631_v17 }
 0x13c   :  { %1536 = vmatpush3.bf16.msra.mxu0 %v1632_v19  ;;  %1558 = vmatpush3.bf16.msra.mxu1 %v1633_v22 }
 0x13d   :  { %1537 = vmatprep.subr.bf16.mxu0 %v1634_v23  ;;  %1559 = vmatprep.subr.bf16.mxu1 %v1635_v38 }
 0x140   :  { %1538 = vmatpush3.bf16.msra.mxu0 %v1636_v27  ;;  %1560 = vmatpush3.bf16.msra.mxu1 %v1637_v29 }
 0x141   :  { %1539 = vmatprep.subr.bf16.mxu0 %v1638_v30  ;;  %1561 = vmatprep.subr.bf16.mxu1 %v1639_v32 }
 0x144   :  { %1540 = vmatpush3.bf16.msra.mxu0 %v1640_v34  ;;  %1562 = vmatpush3.bf16.msra.mxu1 %v1641_v37 }
 0x147   :  { %1473 = vmatmul.mubr.msk.bf16.vlgmr.msra.gmra.mrb[12].mxu0 %vm1471_vm15, %v1472_v40  ;;  %1479 = vmatmul.mubr.msk.bf16.vlgmr.msra.gmra.mrb[12].mxu1 %vm1477_vm0, %v1478_v39 }
 0x1fa   :  { %v1497_v42 = vpop.f32.mrb[8].mxu0  ;;  %v1519_v43 = vpop.f32.mrb[8].mxu1 }
 0x1fb   :  { %v1498_v41 = vpop.f32.mrb[9].mxu0  ;;  %v1520_v47 = vpop.f32.mrb[9].mxu1 }
 0x1fc   :  { %v1499_v45 = vadd.f32 %v1498_v41, %v1497_v42  ;;  %v1500_v48 = vpop.f32.mrb[10].mxu0  ;;  %v1521_v49 = vadd.f32 %v1520_v47, %v1519_v43  ;;  %v1522_v50 = vpop.f32.mrb[10].mxu1 }
 0x1fd   :  { %v1501_v51 = vpop.f32.mrb[11].mxu0  ;;  %v1523_v53 = vpop.f32.mrb[11].mxu1 }
 0x1fe   :  { %v1207_v52 = vadd.f32 %v1499_v45, %v1391_v44 }
 0x200   :  { %v1247_v54 = vadd.f32 %v1521_v49, %v1207_v52 }
 0x21a   :  { %v1541_v55 = vpop.f32.mrb[12].mxu0  ;;  %v1563_v56 = vpop.f32.mrb[12].mxu1 }
 0x21b   :  { %v1542_v57 = vpop.f32.mrb[13].mxu0  ;;  %v1564_v59 = vpop.f32.mrb[13].mxu1 }
 0x21c   :  { %v1543_v58 = vadd.f32 %v1542_v57, %v1541_v55  ;;  %v1544_v60 = vpop.f32.mrb[14].mxu0  ;;  %v1565_v61 = vadd.f32 %v1564_v59, %v1563_v56  ;;  %v1566_v62 = vpop.f32.mrb[14].mxu1 }
 0x21d   :  { %v1545_v46 = vpop.f32.mrb[15].mxu0  ;;  %v1567_v1 = vpop.f32.mrb[15].mxu1 }
 0x21e   :  { %v1287_v63 = vadd.f32 %v1543_v58, %v1247_v54 }
 0x220   :  { %v1327_v2 = vadd.f32 %v1565_v61, %v1287_v63 }
 0x222   :  { %v1480_v3 = vmul.f32 -1.442695, %v1327_v2 }
 0x224   :  { %1642 = vpow2.f32 %v1480_v3 }
 0x22e   :  { %v1643_v4 = vpop.eup %1642 }
 0x22f   :  { %v1335_v5 = vadd.f32 1.0, %v1643_v4 }
 0x231   :  { %1644 = vrcp.f32 %v1335_v5 }
 0x23b   :  { %v1645_v6 = vpop.eup %1644 }
 0x23c   :  { %1338 = vst [vmem:[#allocation11] sm:$0xff] %v1645_v6 }
 0x23d   :  { %1723 = shalt.err (!%p1720_p0)
}
 0x23e   :  { %s1724_s20 = scalar_lea.hbm %s1948_s6, 128 }
 0x23f   :  { %p1725_p1 = scmp.ne.s32.totalorder %s1948_s6, %s1724_s20  ;;  %p1728_p2 = scmp.lt.u32.totalorder %s1724_s20, %s1948_s6 }
 0x241   :  { %p1730_p3 = pnand %p1728_p2, %p1725_p1 }
 0x243   :  { %1733 = shalt.err (!%p1730_p3)
}
 0x244   :  { %1348 = dma.vmem_to_hbm [thread:$0]  %s1346_s16, 128, %s1948_s6, [#allocation7]  }
 0x245   :  { %1738 = dma.done.wait [#allocation7], 128  }
 0x246   :  { %1739 = vsyncadd [#allocation7], 4294967168 }
 0x247   :  { %1352 = vsyncpa [#allocation6], 1 }
 0x248   :  { %1353 = vsyncpa [#allocation9], 1 }
 0x249   :  { %1354 = vsyncpa [#allocation7], 1 }

</bundles_post_ra>
